<compile_context>
chip_gen: v7x
topology: tpu7x:2x2x1
jax: 0.10.0
libtpu: 0.0.40
codegen_flags: <defaults>
</compile_context>

<pallas_src>
from functools import partial

import jax
import jax.numpy as jnp
import numpy as np
from jax.experimental import pallas as pl
from jax.experimental.pallas import tpu as pltpu

# ---- small, deterministic config (mirrors Config fields used by the module) ----
VOCAB_SIZE = 50
EMBED_DIM = 32
SEQ_LEN = 16
NUM_FILTERS = 8
FILTER_SIZES = (2, 3, 4)
NUM_CLASSES = 5
PAD_ID = 0
BATCH = 2

TB = 8          # batch tile (rows of the fused matmul = TB * SEQ_LEN = 128)
C_PAD = 128     # lane-dense FC output width (sliced back to NUM_CLASSES outside)


def textcnn_kernel(ids_ref, table_ref, wf_ref, bconv_ref, mask_ref, fcw_ref, fcb_ref,
                   out_ref, *, tb, l_pad, t, k_max):
    # ids_ref : (tb*l_pad, 1) int32   padded token ids (-1 sentinel -> zero embedding row)
    # table_ref: (V, E) f32           embedding table (VMEM resident)
    # wf_ref  : (k_max*E, 3*NF) f32   fused conv weights  (per-filter blocks zero-padded to k_max)
    # bconv_ref: (1, 3*NF) f32        fused conv bias
    # mask_ref: (t, 3*NF) f32         0 for valid time positions, -1e30 for invalid (per filter size)
    # fcw_ref : (3*NF, C_PAD) f32     FC weight, zero-padded to 128 lanes
    # fcb_ref : (1, C_PAD) f32
    # out_ref : (tb, C_PAD) f32
    V, E = table_ref.shape
    nf3 = wf_ref.shape[1]

    # (1) Embedding gather fused in-kernel: one-hot(ids) @ table on the MXU.
    ids = ids_ref[...]                                                     # (tb*l_pad, 1)
    vocab_iota = jax.lax.broadcasted_iota(jnp.int32, (tb * l_pad, V), 1)
    onehot = (ids == vocab_iota).astype(jnp.float32)                       # sentinel -1 -> all-zero row
    emb = jnp.dot(onehot, table_ref[...], preferred_element_type=jnp.float32)  # (tb*l_pad, E)
    emb = emb.reshape(tb, l_pad, E)                                        # tile-aligned split (l_pad % 8 == 0)

    # (2) im2col once: k_max shifted slices -> single 128-deep contraction for all filter sizes.
    unfold = jnp.concatenate([emb[:, j:j + t, :] for j in range(k_max)], axis=-1)   # (tb, t, k_max*E)
    conv = jnp.dot(unfold.reshape(tb * t, k_max * E), wf_ref[...],
                   preferred_element_type=jnp.float32)                    # one MXU matmul, (tb*t, 3*NF)
    conv = conv.reshape(tb, t, nf3)

    # (3) Mask invalid tail positions, max-pool over time, then bias + ReLU (hoisted past the max).
    pooled = jnp.max(conv + mask_ref[...][None, :, :], axis=1)             # (tb, 3*NF)
    feat = jnp.maximum(pooled + bconv_ref[...], 0.0)

    # TODO(synk): nn.Dropout is identity at inference; training-mode random masking not implemented.

    # (4) FC on the already-contiguous pooled features; lane-dense (128-wide) output store.
    out_ref[...] = jnp.dot(feat, fcw_ref[...], preferred_element_type=jnp.float32) + fcb_ref[...]


def textcnn_forward(ids, params):
    """ids: (B, L) int32 token ids (the PyTorch forward uses x[0] == ids)."""
    emb_table, conv_ws, conv_bs, fcw, fcb = params
    B, L = ids.shape
    K_MAX = max(FILTER_SIZES)
    T = L                                             # time positions evaluated (invalid ones masked)
    L_PAD = ((L + K_MAX - 1 + 7) // 8) * 8            # sequence pad: >= L+K_MAX-1 and multiple of 8
    B_PAD = ((B + TB - 1) // TB) * TB

    # --- glue: pad ids (sentinel -1 -> zero embedding inside the kernel, independent of the table) ---
    ids_p = jnp.full((B_PAD, L_PAD), -1, jnp.int32).at[:B, :L].set(ids.astype(jnp.int32))
    ids_flat = ids_p.reshape(B_PAD * L_PAD, 1)

    # --- glue: fuse conv weights into one (K_MAX*E, 3*NF) matrix (PyTorch layout (NF,1,k,E)) ---
    w_blocks = []
    for w, k in zip(conv_ws, FILTER_SIZES):
        wk = jnp.transpose(w[:, 0], (1, 2, 0))                      # (k, E, NF)
        wk = jnp.pad(wk, ((0, K_MAX - k), (0, 0), (0, 0)))          # (K_MAX, E, NF)
        w_blocks.append(wk.reshape(K_MAX * EMBED_DIM, NUM_FILTERS))
    w_fused = jnp.concatenate(w_blocks, axis=1).astype(jnp.float32)         # (128, 3*NF)
    b_fused = jnp.concatenate(conv_bs).reshape(1, -1).astype(jnp.float32)   # (1, 3*NF)

    # --- glue: additive mask for invalid time positions (t >= L-k+1) per filter size ---
    t_idx = np.arange(T)[:, None]
    limits = np.repeat([L - k + 1 for k in FILTER_SIZES], NUM_FILTERS)[None, :]
    mask = jnp.asarray(np.where(t_idx < limits, 0.0, -1e30), jnp.float32)   # (T, 3*NF)

    # --- glue: lane-dense FC params (pad classes 5 -> 128; sliced back after the kernel) ---
    nf3 = NUM_FILTERS * len(FILTER_SIZES)
    fcw_p = jnp.zeros((nf3, C_PAD), jnp.float32).at[:, :NUM_CLASSES].set(fcw.T)
    fcb_p = jnp.zeros((1, C_PAD), jnp.float32).at[:, :NUM_CLASSES].set(fcb)

    n_rows = TB * L_PAD
    kern = partial(textcnn_kernel, tb=TB, l_pad=L_PAD, t=T, k_max=K_MAX)

    out = pl.pallas_call(
        kern,
        out_shape=jax.ShapeDtypeStruct((B_PAD, C_PAD), jnp.float32),
        grid_spec=pltpu.PrefetchScalarGridSpec(
            num_scalar_prefetch=0,
            grid=(B_PAD // TB,),
            in_specs=[
                pl.BlockSpec((n_rows, 1), lambda i: (i, 0)),                 # ids (per batch block)
                pl.BlockSpec(emb_table.shape, lambda i: (0, 0)),             # embedding table (resident)
                pl.BlockSpec(w_fused.shape, lambda i: (0, 0)),
                pl.BlockSpec(b_fused.shape, lambda i: (0, 0)),
                pl.BlockSpec(mask.shape, lambda i: (0, 0)),
                pl.BlockSpec(fcw_p.shape, lambda i: (0, 0)),
                pl.BlockSpec(fcb_p.shape, lambda i: (0, 0)),
            ],
            out_specs=pl.BlockSpec((TB, C_PAD), lambda i: (i, 0)),
        ),
        compiler_params=pltpu.CompilerParams(dimension_semantics=("parallel",)),
    )(ids_flat, emb_table.astype(jnp.float32), w_fused, b_fused, mask, fcw_p, fcb_p)

    return out[:B, :NUM_CLASSES]


def make_params(key):
    """Parameters in PyTorch-native layouts (re-layout/fusion happens in the wrapper)."""
    ks = jax.random.split(key, 9)
    emb_table = jax.random.normal(ks[0], (VOCAB_SIZE, EMBED_DIM), jnp.float32)
    emb_table = emb_table.at[PAD_ID].set(0.0)          # padding_idx row is zero
    conv_ws, conv_bs = [], []
    for i, k in enumerate(FILTER_SIZES):
        conv_ws.append((jax.random.normal(ks[1 + 2 * i], (NUM_FILTERS, 1, k, EMBED_DIM)) * 0.1)
                       .astype(jnp.float32))            # Conv2d weight (NF, 1, k, E)
        conv_bs.append((jax.random.normal(ks[2 + 2 * i], (NUM_FILTERS,)) * 0.1).astype(jnp.float32))
    in_feat = NUM_FILTERS * len(FILTER_SIZES)
    fcw = (jax.random.normal(ks[7], (NUM_CLASSES, in_feat)) * 0.1).astype(jnp.float32)   # Linear (C, in)
    fcb = (jax.random.normal(ks[8], (NUM_CLASSES,)) * 0.1).astype(jnp.float32)
    return (emb_table, conv_ws, conv_bs, fcw, fcb)


def ref_forward(ids, params):
    """Pure-JAX reference matching PyTorch Conv2d/NCHW semantics exactly."""
    emb_table, conv_ws, conv_bs, fcw, fcb = params
    emb = jnp.take(emb_table, ids, axis=0)                         # (B, L, E)
    x = emb[:, None, :, :]                                         # (B, 1, L, E) NCHW
    feats = []
    for w, b in zip(conv_ws, conv_bs):
        y = jax.lax.conv_general_dilated(
            x, w, window_strides=(1, 1), padding='VALID',
            dimension_numbers=('NCHW', 'OIHW', 'NCHW'))            # (B, NF, L-k+1, 1)
        y = jax.nn.relu(y + b[None, :, None, None])[..., 0]        # (B, NF, L-k+1)
        feats.append(jnp.max(y, axis=2))                           # (B, NF)
    feat = jnp.concatenate(feats, axis=1)
    return feat @ fcw.T + fcb


if __name__ == "__main__":
    key = jax.random.PRNGKey(0)
    k_params, k_ids = jax.random.split(key)
    params = make_params(k_params)
    ids = jax.random.randint(k_ids, (BATCH, SEQ_LEN), 0, VOCAB_SIZE, dtype=jnp.int32)

    out = jax.block_until_ready(textcnn_forward(ids, params))

    ref = ref_forward(ids, params)
    np.testing.assert_allclose(np.asarray(out), np.asarray(ref), rtol=1e-4, atol=1e-4)
    print("KERNEL_OK")
</pallas_src>

<mosaic_0001>
module attributes {stable_mosaic.version = 11 : i64} {
  func.func @textcnn_kernel(%arg0: i32, %arg1: memref<192x1xi32, #tpu.memory_space<vmem>>, %arg2: memref<50x32xf32, #tpu.memory_space<vmem>>, %arg3: memref<128x24xf32, #tpu.memory_space<vmem>>, %arg4: memref<1x24xf32, #tpu.memory_space<vmem>>, %arg5: memref<16x24xf32, #tpu.memory_space<vmem>>, %arg6: memref<24x128xf32, #tpu.memory_space<vmem>>, %arg7: memref<1x128xf32, #tpu.memory_space<vmem>>, %arg8: memref<8x128xf32, #tpu.memory_space<vmem>>) attributes {dimension_semantics = [#tpu.dimension_semantics<parallel>], iteration_bounds = array<i64: 1>, scalar_prefetch = 0 : i64, scratch_operands = 0 : i64, tpu.core_type = #tpu.core_type<tc>, window_params = [{transform_indices = @transform_0, window_bounds = array<i64: 192, 1>}, {pipeline_mode = #tpu.pipeline_mode<synchronous>, transform_indices = @transform_1, window_bounds = array<i64: 50, 32>}, {pipeline_mode = #tpu.pipeline_mode<synchronous>, transform_indices = @transform_2, window_bounds = array<i64: 128, 24>}, {pipeline_mode = #tpu.pipeline_mode<synchronous>, transform_indices = @transform_3, window_bounds = array<i64: 1, 24>}, {pipeline_mode = #tpu.pipeline_mode<synchronous>, transform_indices = @transform_4, window_bounds = array<i64: 16, 24>}, {pipeline_mode = #tpu.pipeline_mode<synchronous>, transform_indices = @transform_5, window_bounds = array<i64: 24, 128>}, {pipeline_mode = #tpu.pipeline_mode<synchronous>, transform_indices = @transform_6, window_bounds = array<i64: 1, 128>}, {transform_indices = @transform_7, window_bounds = array<i64: 8, 128>}]} {
    %c0 = arith.constant 0 : index
    %c0_0 = arith.constant 0 : index
    %0 = vector.load %arg1[%c0, %c0_0] : memref<192x1xi32, #tpu.memory_space<vmem>>, vector<192x1xi32>
    %1 = tpu.iota {dimensions = array<i32: 1>} : vector<192x50xi32>
    %2 = vector.broadcast %0 : vector<192x1xi32> to vector<192x50xi32>
    %3 = arith.cmpi eq, %2, %1 : vector<192x50xi32>
    %4 = arith.extui %3 : vector<192x50xi1> to vector<192x50xi32>
    %5 = arith.sitofp %4 : vector<192x50xi32> to vector<192x50xf32>
    %c0_1 = arith.constant 0 : index
    %c0_2 = arith.constant 0 : index
    %6 = vector.load %arg2[%c0_1, %c0_2] : memref<50x32xf32, #tpu.memory_space<vmem>>, vector<50x32xf32>
    %cst = arith.constant dense<0.000000e+00> : vector<192x32xf32>
    %7 = tpu.matmul %5, %6, %cst {dimension_numbers = #tpu.dot_dimension_numbers<[1], [0], [0], [1], [0, 0, 1, 1], [], []>} : vector<192x50xf32>, vector<50x32xf32>, vector<192x32xf32> -> vector<192x32xf32>
    %8 = vector.shape_cast %7 : vector<192x32xf32> to vector<8x24x32xf32>
    %9 = vector.extract_strided_slice %8 {offsets = [0, 0, 0], sizes = [8, 16, 32], strides = [1, 1, 1]} : vector<8x24x32xf32> to vector<8x16x32xf32>
    %10 = vector.extract_strided_slice %8 {offsets = [0, 1, 0], sizes = [8, 16, 32], strides = [1, 1, 1]} : vector<8x24x32xf32> to vector<8x16x32xf32>
    %11 = vector.extract_strided_slice %8 {offsets = [0, 2, 0], sizes = [8, 16, 32], strides = [1, 1, 1]} : vector<8x24x32xf32> to vector<8x16x32xf32>
    %12 = vector.extract_strided_slice %8 {offsets = [0, 3, 0], sizes = [8, 16, 32], strides = [1, 1, 1]} : vector<8x24x32xf32> to vector<8x16x32xf32>
    %13 = tpu.concatenate %9, %10, %11, %12 in 2 : vector<8x16x32xf32>, vector<8x16x32xf32>, vector<8x16x32xf32>, vector<8x16x32xf32> -> vector<8x16x128xf32>
    %14 = vector.shape_cast %13 : vector<8x16x128xf32> to vector<128x128xf32>
    %c0_3 = arith.constant 0 : index
    %c0_4 = arith.constant 0 : index
    %15 = vector.load %arg3[%c0_3, %c0_4] : memref<128x24xf32, #tpu.memory_space<vmem>>, vector<128x24xf32>
    %cst_5 = arith.constant dense<0.000000e+00> : vector<128x24xf32>
    %16 = tpu.matmul %14, %15, %cst_5 {dimension_numbers = #tpu.dot_dimension_numbers<[1], [0], [0], [1], [0, 0, 1, 1], [], []>} : vector<128x128xf32>, vector<128x24xf32>, vector<128x24xf32> -> vector<128x24xf32>
    %17 = vector.shape_cast %16 : vector<128x24xf32> to vector<8x16x24xf32>
    %c0_6 = arith.constant 0 : index
    %c0_7 = arith.constant 0 : index
    %18 = vector.load %arg5[%c0_6, %c0_7] : memref<16x24xf32, #tpu.memory_space<vmem>>, vector<16x24xf32>
    %19 = vector.shape_cast %18 : vector<16x24xf32> to vector<1x16x24xf32>
    %20 = vector.broadcast %19 : vector<1x16x24xf32> to vector<8x16x24xf32>
    %21 = arith.addf %17, %20 : vector<8x16x24xf32>
    %cst_8 = arith.constant dense<0xFF800000> : vector<8x24xf32>
    %22 = vector.multi_reduction <maximumf>, %21, %cst_8 [1] : vector<8x16x24xf32> to vector<8x24xf32>
    %c0_9 = arith.constant 0 : index
    %c0_10 = arith.constant 0 : index
    %23 = vector.load %arg4[%c0_9, %c0_10] : memref<1x24xf32, #tpu.memory_space<vmem>>, vector<1x24xf32>
    %24 = vector.broadcast %23 : vector<1x24xf32> to vector<8x24xf32>
    %25 = arith.addf %22, %24 : vector<8x24xf32>
    %cst_11 = arith.constant 0.000000e+00 : f32
    %26 = vector.broadcast %cst_11 : f32 to vector<8x24xf32>
    %27 = arith.maximumf %25, %26 : vector<8x24xf32>
    %c0_12 = arith.constant 0 : index
    %c0_13 = arith.constant 0 : index
    %28 = vector.load %arg6[%c0_12, %c0_13] : memref<24x128xf32, #tpu.memory_space<vmem>>, vector<24x128xf32>
    %cst_14 = arith.constant dense<0.000000e+00> : vector<8x128xf32>
    %29 = tpu.matmul %27, %28, %cst_14 {dimension_numbers = #tpu.dot_dimension_numbers<[1], [0], [0], [1], [0, 0, 1, 1], [], []>} : vector<8x24xf32>, vector<24x128xf32>, vector<8x128xf32> -> vector<8x128xf32>
    %c0_15 = arith.constant 0 : index
    %c0_16 = arith.constant 0 : index
    %30 = vector.load %arg7[%c0_15, %c0_16] : memref<1x128xf32, #tpu.memory_space<vmem>>, vector<1x128xf32>
    %31 = vector.broadcast %30 : vector<1x128xf32> to vector<8x128xf32>
    %32 = arith.addf %29, %31 : vector<8x128xf32>
    %c0_17 = arith.constant 0 : index
    %c0_18 = arith.constant 0 : index
    %33 = vector.load %arg8[%c0_17, %c0_18] : memref<8x128xf32, #tpu.memory_space<vmem>>, vector<8x128xf32>
    tpu.vector_store %arg8[%c0_17, %c0_18], %32 {strides = array<i32>} : memref<8x128xf32, #tpu.memory_space<vmem>>, vector<8x128xf32>,
    return
  }
  func.func @transform_0(%arg0: i32) -> (i32, i32) {
    %c0_i32 = arith.constant 0 : i32
    %c0_i32_0 = arith.constant 0 : i32
    return %arg0, %c0_i32 : i32, i32
  }
  func.func @transform_1(%arg0: i32) -> (i32, i32) {
    %c0_i32 = arith.constant 0 : i32
    %c0_i32_0 = arith.constant 0 : i32
    %c0_i32_1 = arith.constant 0 : i32
    return %c0_i32, %c0_i32_0 : i32, i32
  }
  func.func @transform_2(%arg0: i32) -> (i32, i32) {
    %c0_i32 = arith.constant 0 : i32
    %c0_i32_0 = arith.constant 0 : i32
    %c0_i32_1 = arith.constant 0 : i32
    return %c0_i32, %c0_i32_0 : i32, i32
  }
  func.func @transform_3(%arg0: i32) -> (i32, i32) {
    %c0_i32 = arith.constant 0 : i32
    %c0_i32_0 = arith.constant 0 : i32
    %c0_i32_1 = arith.constant 0 : i32
    return %c0_i32, %c0_i32_0 : i32, i32
  }
  func.func @transform_4(%arg0: i32) -> (i32, i32) {
    %c0_i32 = arith.constant 0 : i32
    %c0_i32_0 = arith.constant 0 : i32
    %c0_i32_1 = arith.constant 0 : i32
    return %c0_i32, %c0_i32_0 : i32, i32
  }
  func.func @transform_5(%arg0: i32) -> (i32, i32) {
    %c0_i32 = arith.constant 0 : i32
    %c0_i32_0 = arith.constant 0 : i32
    %c0_i32_1 = arith.constant 0 : i32
    return %c0_i32, %c0_i32_0 : i32, i32
  }
  func.func @transform_6(%arg0: i32) -> (i32, i32) {
    %c0_i32 = arith.constant 0 : i32
    %c0_i32_0 = arith.constant 0 : i32
    %c0_i32_1 = arith.constant 0 : i32
    return %c0_i32, %c0_i32_0 : i32, i32
  }
  func.func @transform_7(%arg0: i32) -> (i32, i32) {
    %c0_i32 = arith.constant 0 : i32
    %c0_i32_0 = arith.constant 0 : i32
    return %arg0, %c0_i32 : i32, i32
  }
}

</mosaic_0001>

<bundles_post_ra>
// kernel: tpu_custom_call.1
= control target key start
LH: loop header
LB: loop body
LE: loop exit
PB: predicated region body
PF: predicated region fallthrough
CT: control target
= control target key end

     0   :  { %v1644_v2 = vmov 0   ;;  %s2205_s0 = inlined_call_operand.vmem [shape: s32[192,1], index: 0, kind: input, shape index: {}]   ;;  %s2206_s1 = inlined_call_operand.vmem [shape: f32[50,32], index: 1, kind: input, shape index: {}]   ;;  %s2207_s2 = inlined_call_operand.vmem [shape: f32[128,24], index: 2, kind: input, shape index: {}]   ;;  %s2208_s3 = inlined_call_operand.vmem [shape: f32[1,24], index: 3, kind: input, shape index: {}]   ;;  %s2209_s4 = inlined_call_operand.vmem [shape: f32[16,24], index: 4, kind: input, shape index: {}]   ;;  %s2210_s5 = inlined_call_operand.vmem [shape: f32[24,128], index: 5, kind: input, shape index: {}]   ;;  %s2211_s6 = inlined_call_operand.vmem [shape: f32[1,128], index: 6, kind: input, shape index: {}]   ;;  %s2212_s7 = inlined_call_operand.hbm [shape: f32[8,128], index: 7, kind: output, shape index: {}]  }
   0x1   :  { %v29_v0 = vld [vmem:[%s2205_s0 + $0x10] sm:$0xff]  ;;  %v27_v1 = vld [vmem:[%s2205_s0] sm:$0xff]  ;;  %1499 = vset.pattern.permute.xlu1 %v1644_v2  ;;  %1498 = vset.pattern.permute.xlu0 %v1644_v2  ;;  %v30_v3 = vld [vmem:[%s2205_s0 + $0x18] sm:$0xff] }
   0x2   :  { %60 = vperm.xlu1 %1499, %v29_v0   ;;  %54 = vperm.xlu0 %1498, %v27_v1   ;;  %v28_v4 = vld [vmem:[%s2205_s0 + $0x8] sm:$0xff]  ;;  %v31_v6 = vld [vmem:[%s2205_s0 + $0x20] sm:$0xff]  ;;  %v199_v9 = vld [vmem:[%s2206_s1 + $0x10] sm:$0xff] }
   0x3   :  { %v32_v5 = vld [vmem:[%s2205_s0 + $0x28] sm:$0xff]  ;;  %v197_v7 = vld [vmem:[%s2206_s1] sm:$0xff]  ;;  %v200_v11 = vld [vmem:[%s2206_s1 + $0x18] sm:$0xff] }
   0x4   :  { %v198_v8 = vld [vmem:[%s2206_s1 + $0x8] sm:$0xff]  ;;  %v1447_v12 = vpack.c.bf16 %v200_v11, %v199_v9  ;;  %v201_v13 = vld [vmem:[%s2206_s1 + $0x20] sm:$0xff] }
   0x5   :  { %v1443_v10 = vpack.c.bf16 %v198_v8, %v197_v7  ;;  %v202_v14 = vld [vmem:[%s2206_s1 + $0x28] sm:$0xff] }
   0x6   :  { %63 = vperm.xlu1 %1499, %v30_v3   ;;  %57 = vperm.xlu0 %1498, %v28_v4  }
   0xa   :  { %69 = vperm.xlu1 %1499, %v32_v5   ;;  %66 = vperm.xlu0 %1498, %v31_v6  }
   0xb   :  { %12 = vsyncpa [#allocation3], 0  ;;  %v34_v15 = vld [vmem:[%s2205_s0 + $0x38] sm:$0xff]  ;;  %v33_v16 = vld [vmem:[%s2205_s0 + $0x30] sm:$0xff]  ;;  %1444 = vmatprep.subr.bf16.mxu0 %v1443_v10  ;;  %v1451_v17 = vpack.c.bf16 %v202_v14, %v201_v13  ;;  %vm277_vm0 = vcmask 1041408   ;;  %v51_v35 = vlaneseq  ;;  %vm204_vm1 = vcmask 408576  }
   0xc   :  { %1446 = vmatpush3.bf16.msra.mxu0 %v1443_v10  ;;  %v36_v18 = vld [vmem:[%s2205_s0 + $0x48] sm:$0xff]  ;;  %v35_v19 = vld [vmem:[%s2205_s0 + $0x40] sm:$0xff]  ;;  %v203_v20 = vld [vmem:[%s2206_s1 + $0x30] sm:$0x3]  ;;  %v1645_v39 = vmov 0.0   ;;  %s1647_s21 = smov 32  }
   0xd   :  { %1448 = vmatprep.subr.bf16.mxu0 %v1447_v12  ;;  %v38_v21 = vld [vmem:[%s2205_s0 + $0x58] sm:$0xff]  ;;  %v37_v22 = vld [vmem:[%s2205_s0 + $0x50] sm:$0xff]  ;;  %v40_v23 = vld [vmem:[%s2205_s0 + $0x68] sm:$0xff]  ;;  %v1785_v36 = vand.u32 127, %v51_v35  ;;  %s1648_s22 = smov 96   ;;  %s1651_s11 = smov [#allocation2]  }
   0xe   :  { %75 = vperm.xlu1 %1499, %v34_v15   ;;  %72 = vperm.xlu0 %1498, %v33_v16   ;;  %v39_v24 = vld [vmem:[%s2205_s0 + $0x60] sm:$0xff]  ;;  %v42_v25 = vld [vmem:[%s2205_s0 + $0x78] sm:$0xff]  ;;  %v41_v26 = vld [vmem:[%s2205_s0 + $0x70] sm:$0xff]  ;;  %s1201_s12 = sshll.u32 %s1651_s11, 4  ;;  %s1202_s12 = int_to_ptr.vmem [resolvable:$true] %s1201_s12 }
   0xf   :  { %v44_v27 = vld [vmem:[%s2205_s0 + $0x88] sm:$0xff]  ;;  %v43_v28 = vld [vmem:[%s2205_s0 + $0x80] sm:$0xff]  ;;  %v46_v29 = vld [vmem:[%s2205_s0 + $0x98] sm:$0xff]  ;;  %s1620_s13 = scalar_lea.vmem %s1202_s12, 128  ;;  %p1625_p1 = scmp.lt.s32.totalorder %s1202_s12, %s1202_s12 }
  0x10   :  { %1450 = vmatpush3.bf16.msra.mxu0 %v1447_v12  ;;  %v45_v30 = vld [vmem:[%s2205_s0 + $0x90] sm:$0xff]  ;;  %v48_v31 = vld [vmem:[%s2205_s0 + $0xa8] sm:$0xff]  ;;  %v47_v32 = vld [vmem:[%s2205_s0 + $0xa0] sm:$0xff]  ;;  %p1621_p0 = scmp.ne.s32.totalorder %s1202_s12, %s1620_s13  ;;  %p1626_p2 = scmp.lt.s32.totalorder %s1620_s13, %s1620_s13 }
  0x11   :  { %1452 = vmatprep.subr.bf16.mxu0 %v1451_v17  ;;  %v50_v33 = vld [vmem:[%s2205_s0 + $0xb8] sm:$0xff]  ;;  %v49_v34 = vld [vmem:[%s2205_s0 + $0xb0] sm:$0xff]  ;;  %v817_v35 = vld [vmem:[%s2207_s2 + $0x48] sm:$0xff] }
  0x12   :  { %81 = vperm.xlu1 %1499, %v36_v18   ;;  %78 = vperm.xlu0 %1498, %v35_v19   ;;  %p1627_p3 = por %p1626_p2, %p1625_p1 }
  0x14   :  { %1454 = vmatpush3.bf16.msra.mxu0 %v1451_v17  ;;  %p1628_p4 = pnand %p1627_p3, %p1621_p0 }
  0x15   :  { %1340 = vmatprep.subr.msk.mxu0 %vm277_vm0, %v203_v20 }
  0x16   :  { %87 = vperm.xlu1 %1499, %v38_v21   ;;  %84 = vperm.xlu0 %1498, %v37_v22   ;;  %v808_v22 = vld [vmem:[%s2207_s2] sm:$0xff] }
  0x18   :  { %1341 = vmatpush3.msk.msra.mxu0 %vm277_vm0, %v203_v20 }
  0x1a   :  { %93 = vperm.xlu1 %1499, %v40_v23   ;;  %90 = vperm.xlu0 %1498, %v39_v24   ;;  %v809_v23 = vld [vmem:[%s2207_s2 + $0x8] sm:$0xff]  ;;  %v810_v24 = vld [vmem:[%s2207_s2 + $0x10] sm:$0xff] }
  0x1e   :  { %99 = vperm.xlu1 %1499, %v42_v25   ;;  %96 = vperm.xlu0 %1498, %v41_v26   ;;  %v1455_v25 = vpack.c.bf16 %v809_v23, %v808_v22  ;;  %v811_v26 = vld [vmem:[%s2207_s2 + $0x18] sm:$0xff] }
  0x20   :  { %1456 = vmatprep.subr.bf16.mxu1 %v1455_v25 }
  0x21   :  { %1458 = vmatpush3.bf16.msra.mxu1 %v1455_v25 }
  0x22   :  { %105 = vperm.xlu1 %1499, %v44_v27   ;;  %102 = vperm.xlu0 %1498, %v43_v28   ;;  %v1459_v27 = vpack.c.bf16 %v811_v26, %v810_v24  ;;  %v812_v28 = vld [vmem:[%s2207_s2 + $0x20] sm:$0xff] }
  0x24   :  { %1460 = vmatprep.subr.bf16.mxu1 %v1459_v27 }
  0x25   :  { %1462 = vmatpush3.bf16.msra.mxu1 %v1459_v27 }
  0x26   :  { %111 = vperm.xlu1 %1499, %v46_v29   ;;  %108 = vperm.xlu0 %1498, %v45_v30   ;;  %v813_v29 = vld [vmem:[%s2207_s2 + $0x28] sm:$0xff] }
  0x27   :  { %v1463_v30 = vpack.c.bf16 %v813_v29, %v812_v28 }
  0x29   :  { %1464 = vmatprep.subr.bf16.mxu1 %v1463_v30 }
  0x2a   :  { %117 = vperm.xlu1 %1499, %v48_v31   ;;  %114 = vperm.xlu0 %1498, %v47_v32   ;;  %v814_v31 = vld [vmem:[%s2207_s2 + $0x30] sm:$0xff]  ;;  %v815_v32 = vld [vmem:[%s2207_s2 + $0x38] sm:$0xff] }
  0x2b   :  { %1466 = vmatpush3.bf16.msra.mxu1 %v1463_v30 }
  0x2e   :  { %123 = vperm.xlu1 %1499, %v50_v33   ;;  %120 = vperm.xlu0 %1498, %v49_v34   ;;  %v1467_v33 = vpack.c.bf16 %v815_v32, %v814_v31  ;;  %v816_v34 = vld [vmem:[%s2207_s2 + $0x40] sm:$0xff] }
  0x30   :  { %1468 = vmatprep.subr.bf16.mxu1 %v1467_v33 }
  0x31   :  { %1470 = vmatpush3.bf16.msra.mxu1 %v1467_v33 }
  0x81   :  { %v61_v37 = vpop.permute.xlu1 %60  ;;  %v55_v38 = vpop.permute.xlu0 %54 }
  0x82   :  { %vm125_vm2 = vcmp.eq.s32.totalorder %v55_v38, %v1785_v36  ;;  %vm127_vm3 = vcmp.eq.s32.totalorder %v61_v37, %v1785_v36  ;;  %v818_v37 = vld [vmem:[%s2207_s2 + $0x50] sm:$0xff]  ;;  %v819_v38 = vld [vmem:[%s2207_s2 + $0x58] sm:$0xff] }
  0x83   :  { %v1209_v40 = vsel %vm125_vm2, 1.0, %v1645_v39  ;;  %v1211_v43 = vsel %vm127_vm3, 1.0, %v1645_v39 }
  0x84   :  { %1342 = vmatprep.mubr.msk.f32.mxu0 %vm204_vm1, %v1209_v40  ;;  %v1475_v40 = vpack.c.bf16 %v819_v38, %v818_v37 }
  0x85   :  { %v64_v41 = vpop.permute.xlu1 %63  ;;  %v58_v42 = vpop.permute.xlu0 %57 }
  0x86   :  { %vm126_vm4 = vcmp.eq.s32.totalorder %v58_v42, %v1785_v36  ;;  %vm128_vm5 = vcmp.eq.s32.totalorder %v64_v41, %v1785_v36  ;;  %v820_v41 = vld [vmem:[%s2207_s2 + $0x60] sm:$0xff]  ;;  %v821_v42 = vld [vmem:[%s2207_s2 + $0x68] sm:$0xff] }
  0x87   :  { %v1210_v44 = vsel %vm126_vm4, 1.0, %v1645_v39  ;;  %v1212_v47 = vsel %vm128_vm5, 1.0, %v1645_v39 }
  0x88   :  { %1343 = vmatmul.mubr.msk.f32.vlgmr.msra.gmra.mrb[0].mxu0 %vm204_vm1, %v1210_v44 }
  0x89   :  { %v70_v45 = vpop.permute.xlu1 %69  ;;  %1345 = vmatprep.mubr.msk.f32.mxu0 %vm204_vm1, %v1211_v43  ;;  %v67_v46 = vpop.permute.xlu0 %66  ;;  %v1479_v43 = vpack.c.bf16 %v821_v42, %v820_v41 }
  0x8a   :  { %vm129_vm6 = vcmp.eq.s32.totalorder %v67_v46, %v1785_v36  ;;  %vm130_vm7 = vcmp.eq.s32.totalorder %v70_v45, %v1785_v36 }
  0x8b   :  { %v1213_v48 = vsel %vm129_vm6, 1.0, %v1645_v39  ;;  %v1214_v51 = vsel %vm130_vm7, 1.0, %v1645_v39 }
  0x8c   :  { %1346 = vmatmul.mubr.msk.f32.gmra.mrb[2].mxu0 %vm204_vm1, %v1212_v47 }
  0x8d   :  { %v76_v49 = vpop.permute.xlu1 %75  ;;  %1348 = vmatprep.mubr.msk.f32.mxu0 %vm204_vm1, %v1213_v48  ;;  %v73_v50 = vpop.permute.xlu0 %72 }
  0x8e   :  { %vm131_vm8 = vcmp.eq.s32.totalorder %v73_v50, %v1785_v36  ;;  %vm132_vm9 = vcmp.eq.s32.totalorder %v76_v49, %v1785_v36 }
  0x8f   :  { %v1215_v52 = vsel %vm131_vm8, 1.0, %v1645_v39  ;;  %v1216_v55 = vsel %vm132_vm9, 1.0, %v1645_v39 }
  0x90   :  { %1349 = vmatmul.mubr.msk.f32.gmra.mrb[4].mxu0 %vm204_vm1, %v1214_v51 }
  0x91   :  { %v82_v53 = vpop.permute.xlu1 %81  ;;  %1351 = vmatprep.mubr.msk.f32.mxu0 %vm204_vm1, %v1215_v52  ;;  %v79_v54 = vpop.permute.xlu0 %78  ;;  %v822_v52 = vld [vmem:[%s2207_s2 + $0x70] sm:$0xff] }
  0x92   :  { %vm133_vm10 = vcmp.eq.s32.totalorder %v79_v54, %v1785_v36  ;;  %vm134_vm11 = vcmp.eq.s32.totalorder %v82_v53, %v1785_v36  ;;  %v823_v53 = vld [vmem:[%s2207_s2 + $0x78] sm:$0xff]  ;;  %s1646_s2 = smov 64  }
  0x93   :  { %v1217_v56 = vsel %vm133_vm10, 1.0, %v1645_v39  ;;  %v1218_v59 = vsel %vm134_vm11, 1.0, %v1645_v39  ;;  %vm490_vm11 = vcmask 1046528   ;;  %v1483_v54 = vpack.c.bf16 %v823_v53, %v822_v52 }
  0x94   :  { %1352 = vmatmul.mubr.msk.f32.gmra.mrb[6].mxu0 %vm204_vm1, %v1216_v55 }
  0x95   :  { %v88_v57 = vpop.permute.xlu1 %87  ;;  %1354 = vmatprep.mubr.msk.f32.mxu0 %vm204_vm1, %v1217_v56  ;;  %v85_v58 = vpop.permute.xlu0 %84 }
  0x96   :  { %vm135_vm12 = vcmp.eq.s32.totalorder %v85_v58, %v1785_v36  ;;  %vm136_vm13 = vcmp.eq.s32.totalorder %v88_v57, %v1785_v36 }
  0x97   :  { %v1219_v60 = vsel %vm135_vm12, 1.0, %v1645_v39  ;;  %v1220_v63 = vsel %vm136_vm13, 1.0, %v1645_v39  ;;  %vm668_vm12 = vcmask 1044480   ;;  %vm757_vm13 = vcmask 261120  }
  0x98   :  { %1355 = vmatmul.mubr.msk.f32.gmra.mrb[8].mxu0 %vm204_vm1, %v1218_v59 }
  0x99   :  { %v94_v61 = vpop.permute.xlu1 %93  ;;  %1357 = vmatprep.mubr.msk.f32.mxu0 %vm204_vm1, %v1219_v60  ;;  %v91_v62 = vpop.permute.xlu0 %90 }
  0x9a   :  { %vm137_vm14 = vcmp.eq.s32.totalorder %v91_v62, %v1785_v36  ;;  %vm138_vm15 = vcmp.eq.s32.totalorder %v94_v61, %v1785_v36 }
  0x9b   :  { %v1221_v0 = vsel %vm137_vm14, 1.0, %v1645_v39  ;;  %v1222_v3 = vsel %vm138_vm15, 1.0, %v1645_v39  ;;  %vm774_vm14 = vcmask 523264   ;;  %vm791_vm15 = vcmask 785408  }
  0x9c   :  { %1358 = vmatmul.mubr.msk.f32.gmra.mrb[10].mxu0 %vm204_vm1, %v1220_v63 }
  0x9d   :  { %v100_v1 = vpop.permute.xlu1 %99  ;;  %1360 = vmatprep.mubr.msk.f32.mxu0 %vm204_vm1, %v1221_v0  ;;  %v97_v2 = vpop.permute.xlu0 %96 }
  0x9e   :  { %vm139_vm0 = vcmp.eq.s32.totalorder %v97_v2, %v1785_v36  ;;  %vm140_vm2 = vcmp.eq.s32.totalorder %v100_v1, %v1785_v36 }
  0x9f   :  { %v1223_v4 = vsel %vm139_vm0, 1.0, %v1645_v39  ;;  %v1224_v7 = vsel %vm140_vm2, 1.0, %v1645_v39  ;;  %vm1650_vm0 = vmmov 0   ;;  %vm987_vm2 = vcmask 195584  }
  0xa0   :  { %1361 = vmatmul.mubr.msk.f32.gmra.mrb[12].mxu0 %vm204_vm1, %v1222_v3 }
  0xa1   :  { %v106_v5 = vpop.permute.xlu1 %105  ;;  %1363 = vmatprep.mubr.msk.f32.mxu0 %vm204_vm1, %v1223_v4  ;;  %v103_v6 = vpop.permute.xlu0 %102 }
  0xa2   :  { %vm141_vm3 = vcmp.eq.s32.totalorder %v103_v6, %v1785_v36  ;;  %vm142_vm4 = vcmp.eq.s32.totalorder %v106_v5, %v1785_v36 }
  0xa3   :  { %v1225_v8 = vsel %vm141_vm3, 1.0, %v1645_v39  ;;  %v1226_v11 = vsel %vm142_vm4, 1.0, %v1645_v39  ;;  %vm1102_vm3 = vcmask 1041409   ;;  %vm1105_vm4 = vcmask 1042434  }
  0xa4   :  { %1364 = vmatmul.mubr.msk.f32.gmra.mrb[14].mxu0 %vm204_vm1, %v1224_v7 }
  0xa5   :  { %v112_v9 = vpop.permute.xlu1 %111  ;;  %1366 = vmatprep.mubr.msk.f32.mxu0 %vm204_vm1, %v1225_v8  ;;  %v109_v10 = vpop.permute.xlu0 %108 }
  0xa6   :  { %vm143_vm5 = vcmp.eq.s32.totalorder %v109_v10, %v1785_v36  ;;  %vm144_vm6 = vcmp.eq.s32.totalorder %v112_v9, %v1785_v36 }
  0xa7   :  { %v1227_v12 = vsel %vm143_vm5, 1.0, %v1645_v39  ;;  %v1228_v15 = vsel %vm144_vm6, 1.0, %v1645_v39  ;;  %vm1108_vm5 = vcmask 1043459   ;;  %vm1111_vm6 = vcmask 1044484  }
  0xa8   :  { %1367 = vmatmul.mubr.msk.f32.gmra.mrb[16].mxu0 %vm204_vm1, %v1226_v11 }
  0xa9   :  { %v118_v13 = vpop.permute.xlu1 %117  ;;  %1369 = vmatprep.mubr.msk.f32.mxu0 %vm204_vm1, %v1227_v12  ;;  %v115_v14 = vpop.permute.xlu0 %114 }
  0xaa   :  { %vm145_vm7 = vcmp.eq.s32.totalorder %v115_v14, %v1785_v36  ;;  %vm146_vm8 = vcmp.eq.s32.totalorder %v118_v13, %v1785_v36 }
  0xab   :  { %v1229_v16 = vsel %vm145_vm7, 1.0, %v1645_v39  ;;  %v1230_v19 = vsel %vm146_vm8, 1.0, %v1645_v39  ;;  %vm1114_vm7 = vcmask 1045509   ;;  %vm1117_vm8 = vcmask 1046534  }
  0xac   :  { %1370 = vmatmul.mubr.msk.f32.gmra.mrb[18].mxu0 %vm204_vm1, %v1228_v15 }
  0xad   :  { %v124_v17 = vpop.permute.xlu1 %123  ;;  %1372 = vmatprep.mubr.msk.f32.mxu0 %vm204_vm1, %v1229_v16  ;;  %v121_v18 = vpop.permute.xlu0 %120 }
  0xae   :  { %vm147_vm9 = vcmp.eq.s32.totalorder %v121_v18, %v1785_v36  ;;  %vm148_vm10 = vcmp.eq.s32.totalorder %v124_v17, %v1785_v36  ;;  %v1471_v36 = vpack.c.bf16 %v817_v35, %v816_v34 }
  0xaf   :  { %v1231_v20 = vsel %vm147_vm9, 1.0, %v1645_v39  ;;  %v1232_v21 = vsel %vm148_vm10, 1.0, %v1645_v39  ;;  %vm1120_vm9 = vcmask 1047559  }
  0xb0   :  { %1373 = vmatmul.mubr.msk.f32.gmra.mrb[20].mxu0 %vm204_vm1, %v1230_v19  ;;  %1472 = vmatprep.subr.bf16.mxu1 %v1471_v36 }
  0xb1   :  { %1375 = vmatprep.mubr.msk.f32.mxu0 %vm204_vm1, %v1231_v20  ;;  %1474 = vmatpush3.bf16.msra.mxu1 %v1471_v36 }
  0xb2   :  { %1476 = vmatprep.subr.bf16.mxu1 %v1475_v40 }
  0xb4   :  { %1376 = vmatmul.mubr.msk.f32.gmra.mrb[22].mxu0 %vm204_vm1, %v1232_v21  ;;  %vm579_vm1 = vcmask 1045504  }
  0xb5   :  { %1478 = vmatpush3.bf16.msra.mxu1 %v1475_v40  ;;  %1440 = vmatprep.mubr.msk.f32.mxu0 %vm1650_vm0, %v1645_v39 }
  0xb6   :  { %1480 = vmatprep.subr.bf16.mxu1 %v1479_v43 }
  0xb9   :  { %1482 = vmatpush3.bf16.msra.mxu1 %v1479_v43 }
  0xba   :  { %1484 = vmatprep.subr.bf16.mxu1 %v1483_v54 }
  0xbd   :  { %1486 = vmatpush3.bf16.msra.mxu1 %v1483_v54 }
 0x15b   :  { %v1901_v44 = vpop.f32.mrb[0].mxu0 }
 0x15c   :  { %v492_v45 = vrot.slane %v1901_v44, 1  ;;  %v581_v46 = vrot.slane %v1901_v44, 2  ;;  %v670_v47 = vrot.slane %v1901_v44, 3  ;;  %v1906_v48 = vpop.f32.mrb[1].mxu0 }
 0x15d   :  { %v491_v49 = vrot.slane %v1906_v48, 1  ;;  %v580_v50 = vrot.slane %v1906_v48, 2  ;;  %v669_v51 = vrot.slane %v1906_v48, 3 }
 0x15f   :  { %v1917_v55 = vpop.f32.mrb[2].mxu0  ;;  %v582_v56 = vsel %vm579_vm1, %v580_v50, %v581_v46  ;;  %v493_v57 = vsel %vm490_vm11, %v491_v49, %v492_v45  ;;  %v671_v58 = vsel %vm668_vm12, %v669_v51, %v670_v47 }
 0x160   :  { %v357_v59 = vpop.f32.mrb[3].mxu0  ;;  %v496_v3 = vrot.slane %v1917_v55, 1  ;;  %v585_v8 = vrot.slane %v1917_v55, 2  ;;  %v674_v12 = vrot.slane %v1917_v55, 3 }
 0x161   :  { %v494_v60 = vrot.slane %v357_v59, 1  ;;  %v583_v61 = vrot.slane %v357_v59, 2  ;;  %v672_v62 = vrot.slane %v357_v59, 3 }
 0x163   :  { %v1350_v63 = vpop.f32.mrb[4].mxu0  ;;  %v584_v0 = vsel %vm579_vm1, %v581_v46, %v583_v61  ;;  %v495_v1 = vsel %vm490_vm11, %v492_v45, %v494_v60  ;;  %v673_v2 = vsel %vm668_vm12, %v670_v47, %v672_v62 }
 0x164   :  { %v499_v4 = vrot.slane %v1350_v63, 1  ;;  %v588_v5 = vrot.slane %v1350_v63, 2  ;;  %v1926_v6 = vpop.f32.mrb[5].mxu0  ;;  %v1505_v7 = vpack.i.bf16 %v584_v0, %v582_v56  ;;  %v1500_v11 = vpack.i.bf16 %v495_v1, %v493_v57 }
 0x165   :  { %v497_v9 = vrot.slane %v1926_v6, 1  ;;  %v586_v10 = vrot.slane %v1926_v6, 2  ;;  %v677_v13 = vrot.slane %v1350_v63, 3  ;;  %v675_v14 = vrot.slane %v1926_v6, 3 }
 0x166   :  { %1506 = vrot.lane.b32.xlu1 %v1505_v7, %s1646_s2  ;;  %v1510_v15 = vpack.i.bf16 %v673_v2, %v671_v58  ;;  %1501 = vrot.lane.b32.xlu0 %v1500_v11, %s1647_s21 }
 0x167   :  { %v1935_v16 = vpop.f32.mrb[6].mxu0  ;;  %v498_v17 = vsel %vm490_vm11, %v496_v3, %v497_v9  ;;  %v500_v18 = vsel %vm490_vm11, %v497_v9, %v499_v4  ;;  %v587_v19 = vsel %vm579_vm1, %v585_v8, %v586_v10  ;;  %v589_v20 = vsel %vm579_vm1, %v586_v10, %v588_v5 }
 0x168   :  { %v502_v21 = vrot.slane %v1935_v16, 1  ;;  %v591_v22 = vrot.slane %v1935_v16, 2  ;;  %v680_v23 = vrot.slane %v1935_v16, 3  ;;  %v1944_v24 = vpop.f32.mrb[7].mxu0  ;;  %v1515_v25 = vpack.i.bf16 %v500_v18, %v498_v17 }
 0x169   :  { %v501_v26 = vrot.slane %v1944_v24, 1  ;;  %v590_v27 = vrot.slane %v1944_v24, 2  ;;  %v679_v28 = vrot.slane %v1944_v24, 3  ;;  %v1520_v29 = vpack.i.bf16 %v589_v20, %v587_v19 }
 0x16a   :  { %1516 = vrot.lane.b32.xlu1 %v1515_v25, %s1647_s21  ;;  %v676_v30 = vsel %vm668_vm12, %v674_v12, %v675_v14  ;;  %v678_v31 = vsel %vm668_vm12, %v675_v14, %v677_v13  ;;  %1511 = vrot.lane.b32.xlu0 %v1510_v15, %s1648_s22 }
 0x16b   :  { %v1953_v32 = vpop.f32.mrb[8].mxu0  ;;  %v1525_v33 = vpack.i.bf16 %v678_v31, %v676_v30  ;;  %v592_v34 = vsel %vm579_vm1, %v590_v27, %v591_v22  ;;  %v503_v35 = vsel %vm490_vm11, %v501_v26, %v502_v21  ;;  %v681_v36 = vsel %vm668_vm12, %v679_v28, %v680_v23 }
 0x16c   :  { %v387_v37 = vpop.f32.mrb[9].mxu0  ;;  %v506_v47 = vrot.slane %v1953_v32, 1  ;;  %v595_v53 = vrot.slane %v1953_v32, 2  ;;  %v684_v58 = vrot.slane %v1953_v32, 3 }
 0x16d   :  { %v504_v38 = vrot.slane %v387_v37, 1  ;;  %v593_v40 = vrot.slane %v387_v37, 2  ;;  %v682_v41 = vrot.slane %v387_v37, 3 }
 0x16e   :  { %1526 = vrot.lane.b32.xlu1 %v1525_v33, %s1648_s22  ;;  %1521 = vrot.lane.b32.xlu0 %v1520_v29, %s1646_s2 }
 0x16f   :  { %v1359_v42 = vpop.f32.mrb[10].mxu0  ;;  %v594_v43 = vsel %vm579_vm1, %v591_v22, %v593_v40  ;;  %v505_v45 = vsel %vm490_vm11, %v502_v21, %v504_v38  ;;  %v683_v46 = vsel %vm668_vm12, %v680_v23, %v682_v41 }
 0x170   :  { %v509_v49 = vrot.slane %v1359_v42, 1  ;;  %v598_v50 = vrot.slane %v1359_v42, 2  ;;  %v1964_v51 = vpop.f32.mrb[11].mxu0  ;;  %v1535_v52 = vpack.i.bf16 %v594_v43, %v592_v34  ;;  %v1530_v57 = vpack.i.bf16 %v505_v45, %v503_v35 }
 0x171   :  { %v507_v54 = vrot.slane %v1964_v51, 1  ;;  %v596_v56 = vrot.slane %v1964_v51, 2  ;;  %v687_v59 = vrot.slane %v1359_v42, 3  ;;  %v685_v60 = vrot.slane %v1964_v51, 3 }
 0x172   :  { %1536 = vrot.lane.b32.xlu1 %v1535_v52, %s1646_s2  ;;  %v1540_v61 = vpack.i.bf16 %v683_v46, %v681_v36  ;;  %1531 = vrot.lane.b32.xlu0 %v1530_v57, %s1647_s21 }
 0x173   :  { %v1973_v62 = vpop.f32.mrb[12].mxu0  ;;  %v508_v63 = vsel %vm490_vm11, %v506_v47, %v507_v54  ;;  %v510_v0 = vsel %vm490_vm11, %v507_v54, %v509_v49  ;;  %v597_v1 = vsel %vm579_vm1, %v595_v53, %v596_v56  ;;  %v599_v2 = vsel %vm579_vm1, %v596_v56, %v598_v50 }
 0x174   :  { %v512_v3 = vrot.slane %v1973_v62, 1  ;;  %v601_v4 = vrot.slane %v1973_v62, 2  ;;  %v690_v5 = vrot.slane %v1973_v62, 3  ;;  %v1982_v7 = vpop.f32.mrb[13].mxu0  ;;  %v1545_v8 = vpack.i.bf16 %v510_v0, %v508_v63 }
 0x175   :  { %v511_v9 = vrot.slane %v1982_v7, 1  ;;  %v600_v10 = vrot.slane %v1982_v7, 2  ;;  %v689_v11 = vrot.slane %v1982_v7, 3  ;;  %v1550_v12 = vpack.i.bf16 %v599_v2, %v597_v1 }
 0x176   :  { %1546 = vrot.lane.b32.xlu1 %v1545_v8, %s1647_s21  ;;  %v686_v13 = vsel %vm668_vm12, %v684_v58, %v685_v60  ;;  %v688_v14 = vsel %vm668_vm12, %v685_v60, %v687_v59  ;;  %1541 = vrot.lane.b32.xlu0 %v1540_v61, %s1648_s22 }
 0x177   :  { %v1991_v15 = vpop.f32.mrb[14].mxu0  ;;  %v1555_v17 = vpack.i.bf16 %v688_v14, %v686_v13  ;;  %v602_v18 = vsel %vm579_vm1, %v600_v10, %v601_v4  ;;  %v513_v19 = vsel %vm490_vm11, %v511_v9, %v512_v3  ;;  %v691_v20 = vsel %vm668_vm12, %v689_v11, %v690_v5 }
 0x178   :  { %v417_v21 = vpop.f32.mrb[15].mxu0  ;;  %v516_v30 = vrot.slane %v1991_v15, 1  ;;  %v605_v36 = vrot.slane %v1991_v15, 2  ;;  %v694_v41 = vrot.slane %v1991_v15, 3 }
 0x179   :  { %v514_v22 = vrot.slane %v417_v21, 1  ;;  %v603_v23 = vrot.slane %v417_v21, 2  ;;  %v692_v25 = vrot.slane %v417_v21, 3 }
 0x17a   :  { %1556 = vrot.lane.b32.xlu1 %v1555_v17, %s1648_s22  ;;  %1551 = vrot.lane.b32.xlu0 %v1550_v12, %s1646_s2 }
 0x17b   :  { %v1368_v26 = vpop.f32.mrb[16].mxu0  ;;  %v604_v27 = vsel %vm579_vm1, %v601_v4, %v603_v23  ;;  %v515_v28 = vsel %vm490_vm11, %v512_v3, %v514_v22  ;;  %v693_v29 = vsel %vm668_vm12, %v690_v5, %v692_v25 }
 0x17c   :  { %v519_v31 = vrot.slane %v1368_v26, 1  ;;  %v608_v33 = vrot.slane %v1368_v26, 2  ;;  %v2002_v34 = vpop.f32.mrb[17].mxu0  ;;  %v1565_v35 = vpack.i.bf16 %v604_v27, %v602_v18  ;;  %v1560_v40 = vpack.i.bf16 %v515_v28, %v513_v19 }
 0x17d   :  { %v517_v37 = vrot.slane %v2002_v34, 1  ;;  %v606_v38 = vrot.slane %v2002_v34, 2  ;;  %v697_v42 = vrot.slane %v1368_v26, 3  ;;  %v695_v43 = vrot.slane %v2002_v34, 3 }
 0x17e   :  { %1566 = vrot.lane.b32.xlu1 %v1565_v35, %s1646_s2  ;;  %v1570_v45 = vpack.i.bf16 %v693_v29, %v691_v20  ;;  %1561 = vrot.lane.b32.xlu0 %v1560_v40, %s1647_s21 }
 0x17f   :  { %v2011_v46 = vpop.f32.mrb[18].mxu0  ;;  %v518_v47 = vsel %vm490_vm11, %v516_v30, %v517_v37  ;;  %v520_v49 = vsel %vm490_vm11, %v517_v37, %v519_v31  ;;  %v607_v50 = vsel %vm579_vm1, %v605_v36, %v606_v38  ;;  %v609_v52 = vsel %vm579_vm1, %v606_v38, %v608_v33 }
 0x180   :  { %v522_v53 = vrot.slane %v2011_v46, 1  ;;  %v611_v54 = vrot.slane %v2011_v46, 2  ;;  %v700_v56 = vrot.slane %v2011_v46, 3  ;;  %v2020_v57 = vpop.f32.mrb[19].mxu0  ;;  %v1575_v58 = vpack.i.bf16 %v520_v49, %v518_v47 }
 0x181   :  { %v521_v59 = vrot.slane %v2020_v57, 1  ;;  %v610_v60 = vrot.slane %v2020_v57, 2  ;;  %v699_v61 = vrot.slane %v2020_v57, 3  ;;  %v1580_v63 = vpack.i.bf16 %v609_v52, %v607_v50 }
 0x182   :  { %1576 = vrot.lane.b32.xlu1 %v1575_v58, %s1647_s21  ;;  %v696_v0 = vsel %vm668_vm12, %v694_v41, %v695_v43  ;;  %v698_v1 = vsel %vm668_vm12, %v695_v43, %v697_v42  ;;  %1571 = vrot.lane.b32.xlu0 %v1570_v45, %s1648_s22 }
 0x183   :  { %v2029_v2 = vpop.f32.mrb[20].mxu0  ;;  %v1585_v3 = vpack.i.bf16 %v698_v1, %v696_v0  ;;  %v612_v4 = vsel %vm579_vm1, %v610_v60, %v611_v54  ;;  %v523_v5 = vsel %vm490_vm11, %v521_v59, %v522_v53  ;;  %v701_v8 = vsel %vm668_vm12, %v699_v61, %v700_v56 }
 0x184   :  { %v447_v9 = vpop.f32.mrb[21].mxu0  ;;  %v526_v13 = vrot.slane %v2029_v2, 1  ;;  %v615_v14 = vrot.slane %v2029_v2, 2  ;;  %v704_v31 = vrot.slane %v2029_v2, 3 }
 0x185   :  { %v524_v10 = vrot.slane %v447_v9, 1  ;;  %v613_v11 = vrot.slane %v447_v9, 2  ;;  %v702_v12 = vrot.slane %v447_v9, 3 }
 0x186   :  { %1586 = vrot.lane.b32.xlu1 %v1585_v3, %s1648_s22  ;;  %1581 = vrot.lane.b32.xlu0 %v1580_v63, %s1646_s2 }
 0x187   :  { %v1377_v17 = vpop.f32.mrb[22].mxu0  ;;  %v614_v18 = vsel %vm579_vm1, %v611_v54, %v613_v11  ;;  %v525_v19 = vsel %vm490_vm11, %v522_v53, %v524_v10  ;;  %v703_v20 = vsel %vm668_vm12, %v700_v56, %v702_v12 }
 0x188   :  { %v529_v21 = vrot.slane %v1377_v17, 1  ;;  %v618_v22 = vrot.slane %v1377_v17, 2  ;;  %v707_v23 = vrot.slane %v1377_v17, 3  ;;  %v2041_v25 = vpop.f32.mrb[23].mxu0  ;;  %v1595_v26 = vpack.i.bf16 %v614_v18, %v612_v4 }
 0x189   :  { %v527_v27 = vrot.slane %v2041_v25, 1  ;;  %v616_v28 = vrot.slane %v2041_v25, 2  ;;  %v705_v29 = vrot.slane %v2041_v25, 3  ;;  %v1590_v30 = vpack.i.bf16 %v525_v19, %v523_v5 }
 0x18a   :  { %1596 = vrot.lane.b32.xlu1 %v1595_v26, %s1646_s2  ;;  %v1600_v33 = vpack.i.bf16 %v703_v20, %v701_v8 }
 0x18b   :  { %1591 = vrot.lane.b32.xlu0 %v1590_v30, %s1647_s21  ;;  %v528_v35 = vsel %vm490_vm11, %v526_v13, %v527_v27  ;;  %v530_v36 = vsel %vm490_vm11, %v527_v27, %v529_v21  ;;  %v617_v37 = vsel %vm579_vm1, %v615_v14, %v616_v28  ;;  %v619_v38 = vsel %vm579_vm1, %v616_v28, %v618_v22 }
 0x18c   :  { %v1605_v40 = vpack.i.bf16 %v530_v36, %v528_v35  ;;  %v1610_v41 = vpack.i.bf16 %v619_v38, %v617_v37  ;;  %v706_v42 = vsel %vm668_vm12, %v704_v31, %v705_v29  ;;  %v708_v43 = vsel %vm668_vm12, %v705_v29, %v707_v23 }
 0x18d   :  { %v1615_v45 = vpack.i.bf16 %v708_v43, %v706_v42 }
 0x18e   :  { %1606 = vrot.lane.b32.xlu1 %v1605_v40, %s1647_s21 }
 0x18f   :  { %1601 = vrot.lane.b32.xlu0 %v1600_v33, %s1648_s22 }
 0x192   :  { %1616 = vrot.lane.b32.xlu1 %v1615_v45, %s1648_s22 }
 0x193   :  { %1611 = vrot.lane.b32.xlu0 %v1610_v41, %s1646_s2 }
 0x1d8   :  { %v1507_v47 = vpop.permute.xlu1 %1506  ;;  %v1502_v49 = vpop.permute.xlu0 %1501 }
 0x1d9   :  { %v1504_v50 = vunpack.i.h.bf16 %v1502_v49  ;;  %v1503_v52 = vunpack.i.l.bf16 %v1502_v49  ;;  %v1509_v53 = vunpack.i.h.bf16 %v1507_v47  ;;  %v1508_v54 = vunpack.i.l.bf16 %v1507_v47 }
 0x1db   :  { %v758_v58 = vsel %vm757_vm13, %v1906_v48, %v1503_v52  ;;  %v759_v59 = vsel %vm757_vm13, %v1901_v44, %v1504_v50 }
 0x1dc   :  { %v1517_v56 = vpop.permute.xlu1 %1516  ;;  %v1512_v60 = vpop.permute.xlu0 %1511  ;;  %v775_v3 = vsel %vm774_vm14, %v758_v58, %v1508_v54  ;;  %v776_v4 = vsel %vm774_vm14, %v759_v59, %v1509_v53 }
 0x1dd   :  { %v1514_v61 = vunpack.i.h.bf16 %v1512_v60  ;;  %v1513_v63 = vunpack.i.l.bf16 %v1512_v60  ;;  %v1519_v0 = vunpack.i.h.bf16 %v1517_v56  ;;  %v1518_v1 = vunpack.i.l.bf16 %v1517_v56 }
 0x1df   :  { %v792_v8 = vsel %vm791_vm15, %v775_v3, %v1513_v63  ;;  %v793_v9 = vsel %vm791_vm15, %v776_v4, %v1514_v61  ;;  %v760_v13 = vsel %vm757_vm13, %v1917_v55, %v1518_v1  ;;  %v761_v14 = vsel %vm757_vm13, %v1926_v6, %v1519_v0 }
 0x1e0   :  { %v1527_v5 = vpop.permute.xlu1 %1526  ;;  %v1522_v11 = vpop.permute.xlu0 %1521  ;;  %1410 = vmatprep.mubr.f32.mxu1 %v792_v8 }
 0x1e1   :  { %v1529_v48 = vunpack.i.h.bf16 %v1527_v5  ;;  %v1528_v10 = vunpack.i.l.bf16 %v1527_v5  ;;  %v1524_v44 = vunpack.i.h.bf16 %v1522_v11  ;;  %v1523_v12 = vunpack.i.l.bf16 %v1522_v11  ;;  %1411 = vmatmul.mubr.f32.vlgmr.msra.gmra.mrb[0].mxu1 %v793_v9 }
 0x1e3   :  { %v777_v18 = vsel %vm774_vm14, %v760_v13, %v1523_v12  ;;  %v778_v19 = vsel %vm774_vm14, %v761_v14, %v1524_v44 }
 0x1e4   :  { %v1537_v17 = vpop.permute.xlu1 %1536  ;;  %v1532_v20 = vpop.permute.xlu0 %1531  ;;  %v794_v21 = vsel %vm791_vm15, %v777_v18, %v1528_v10  ;;  %v795_v22 = vsel %vm791_vm15, %v778_v19, %v1529_v48 }
 0x1e5   :  { %v1534_v23 = vunpack.i.h.bf16 %v1532_v20  ;;  %v1533_v26 = vunpack.i.l.bf16 %v1532_v20  ;;  %1413 = vmatprep.mubr.f32.mxu1 %v794_v21  ;;  %v1539_v27 = vunpack.i.h.bf16 %v1537_v17  ;;  %v1538_v28 = vunpack.i.l.bf16 %v1537_v17 }
 0x1e6   :  { %1414 = vmatmul.mubr.f32.gmra.mrb[2].mxu1 %v795_v22 }
 0x1e7   :  { %v762_v6 = vsel %vm757_vm13, %v1944_v24, %v1533_v26  ;;  %v763_v29 = vsel %vm757_vm13, %v1935_v16, %v1534_v23 }
 0x1e8   :  { %v1547_v55 = vpop.permute.xlu1 %1546  ;;  %v1542_v30 = vpop.permute.xlu0 %1541  ;;  %v779_v37 = vsel %vm774_vm14, %v762_v6, %v1538_v28  ;;  %v780_v38 = vsel %vm774_vm14, %v763_v29, %v1539_v27 }
 0x1e9   :  { %v1544_v31 = vunpack.i.h.bf16 %v1542_v30  ;;  %v1543_v33 = vunpack.i.l.bf16 %v1542_v30  ;;  %v1549_v35 = vunpack.i.h.bf16 %v1547_v55  ;;  %v1548_v36 = vunpack.i.l.bf16 %v1547_v55 }
 0x1eb   :  { %v796_v41 = vsel %vm791_vm15, %v779_v37, %v1543_v33  ;;  %v797_v42 = vsel %vm791_vm15, %v780_v38, %v1544_v31  ;;  %v764_v49 = vsel %vm757_vm13, %v1953_v32, %v1548_v36  ;;  %v765_v50 = vsel %vm757_vm13, %v1964_v51, %v1549_v35 }
 0x1ec   :  { %v1557_v40 = vpop.permute.xlu1 %1556  ;;  %v1552_v24 = vpop.permute.xlu0 %1551  ;;  %1416 = vmatprep.mubr.f32.mxu1 %v796_v41 }
 0x1ed   :  { %v1559_v43 = vunpack.i.h.bf16 %v1557_v40  ;;  %v1558_v45 = vunpack.i.l.bf16 %v1557_v40  ;;  %v1554_v47 = vunpack.i.h.bf16 %v1552_v24  ;;  %v1553_v16 = vunpack.i.l.bf16 %v1552_v24  ;;  %1417 = vmatmul.mubr.f32.gmra.mrb[4].mxu1 %v797_v42 }
 0x1ef   :  { %v781_v53 = vsel %vm774_vm14, %v764_v49, %v1553_v16  ;;  %v782_v54 = vsel %vm774_vm14, %v765_v50, %v1554_v47 }
 0x1f0   :  { %v1567_v52 = vpop.permute.xlu1 %1566  ;;  %v1562_v56 = vpop.permute.xlu0 %1561  ;;  %v798_v58 = vsel %vm791_vm15, %v781_v53, %v1558_v45  ;;  %v799_v59 = vsel %vm791_vm15, %v782_v54, %v1559_v43 }
 0x1f1   :  { %v1564_v60 = vunpack.i.h.bf16 %v1562_v56  ;;  %v1563_v61 = vunpack.i.l.bf16 %v1562_v56  ;;  %1419 = vmatprep.mubr.f32.mxu1 %v798_v58  ;;  %v1569_v63 = vunpack.i.h.bf16 %v1567_v52  ;;  %v1568_v0 = vunpack.i.l.bf16 %v1567_v52  ;;  %v1083_v56 = vld [vmem:[%s2210_s5] sm:$0xff] }
 0x1f2   :  { %1420 = vmatmul.mubr.f32.gmra.mrb[6].mxu1 %v799_v59  ;;  %v1649_v58 = vmov 0.0|0.0   ;;  %v1085_v59 = vld [vmem:[%s2210_s5 + $0x10] sm:$0xff] }
 0x1f3   :  { %v766_v51 = vsel %vm757_vm13, %v1982_v7, %v1563_v61  ;;  %v767_v1 = vsel %vm757_vm13, %v1973_v62, %v1564_v60  ;;  %1487 = vmatprep.subr.bf16.mxu0 %v1649_v58  ;;  %v2137_v60 = vld [vmem:[%s2209_s4 + $0x8] sm:$0xff]  ;;  %v2142_v61 = vld [vmem:[%s2209_s4] sm:$0xff] }
 0x1f4   :  { %v1577_v32 = vpop.permute.xlu1 %1576  ;;  %v1572_v3 = vpop.permute.xlu0 %1571  ;;  %v783_v48 = vsel %vm774_vm14, %v766_v51, %v1568_v0  ;;  %v784_v10 = vsel %vm774_vm14, %v767_v1, %v1569_v63 }
 0x1f5   :  { %v1574_v4 = vunpack.i.h.bf16 %v1572_v3  ;;  %v1573_v5 = vunpack.i.l.bf16 %v1572_v3  ;;  %v1579_v8 = vunpack.i.h.bf16 %v1577_v32  ;;  %v1578_v9 = vunpack.i.l.bf16 %v1577_v32 }
 0x1f7   :  { %v800_v44 = vsel %vm791_vm15, %v783_v48, %v1573_v5  ;;  %v801_v12 = vsel %vm791_vm15, %v784_v10, %v1574_v4  ;;  %v768_v18 = vsel %vm757_vm13, %v1991_v15, %v1578_v9  ;;  %v769_v19 = vsel %vm757_vm13, %v2002_v34, %v1579_v8 }
 0x1f8   :  { %v1587_v11 = vpop.permute.xlu1 %1586  ;;  %v1582_v7 = vpop.permute.xlu0 %1581  ;;  %1422 = vmatprep.mubr.f32.mxu1 %v800_v44 }
 0x1f9   :  { %v1589_v13 = vunpack.i.h.bf16 %v1587_v11  ;;  %v1588_v14 = vunpack.i.l.bf16 %v1587_v11  ;;  %v1584_v17 = vunpack.i.h.bf16 %v1582_v7  ;;  %v1583_v62 = vunpack.i.l.bf16 %v1582_v7  ;;  %1423 = vmatmul.mubr.f32.gmra.mrb[8].mxu1 %v801_v12 }
 0x1fb   :  { %v785_v21 = vsel %vm774_vm14, %v768_v18, %v1583_v62  ;;  %v786_v22 = vsel %vm774_vm14, %v769_v19, %v1584_v17 }
 0x1fc   :  { %v1597_v20 = vpop.permute.xlu1 %1596  ;;  %v802_v26 = vsel %vm791_vm15, %v785_v21, %v1588_v14  ;;  %v803_v27 = vsel %vm791_vm15, %v786_v22, %v1589_v13 }
 0x1fd   :  { %v1592_v23 = vpop.permute.xlu0 %1591  ;;  %1425 = vmatprep.mubr.f32.mxu1 %v802_v26  ;;  %v1599_v6 = vunpack.i.h.bf16 %v1597_v20  ;;  %v1598_v29 = vunpack.i.l.bf16 %v1597_v20 }
 0x1fe   :  { %v1594_v28 = vunpack.i.h.bf16 %v1592_v23  ;;  %v1593_v55 = vunpack.i.l.bf16 %v1592_v23  ;;  %1426 = vmatmul.mubr.f32.gmra.mrb[10].mxu1 %v803_v27 }
 0x200   :  { %v1607_v15 = vpop.permute.xlu1 %1606  ;;  %v770_v34 = vsel %vm757_vm13, %v2020_v57, %v1593_v55  ;;  %v771_v30 = vsel %vm757_vm13, %v2011_v46, %v1594_v28 }
 0x201   :  { %v1602_v31 = vpop.permute.xlu0 %1601  ;;  %v1609_v36 = vunpack.i.h.bf16 %v1607_v15  ;;  %v1608_v37 = vunpack.i.l.bf16 %v1607_v15  ;;  %v787_v38 = vsel %vm774_vm14, %v770_v34, %v1598_v29  ;;  %v788_v40 = vsel %vm774_vm14, %v771_v30, %v1599_v6 }
 0x202   :  { %v1604_v33 = vunpack.i.h.bf16 %v1602_v31  ;;  %v1603_v35 = vunpack.i.l.bf16 %v1602_v31 }
 0x203   :  { %v772_v16 = vsel %vm757_vm13, %v2029_v2, %v1608_v37  ;;  %v773_v49 = vsel %vm757_vm13, %v2041_v25, %v1609_v36  ;;  %v1084_v2 = vld [vmem:[%s2210_s5 + $0x8] sm:$0xff] }
 0x204   :  { %v1617_v41 = vpop.permute.xlu1 %1616  ;;  %v804_v42 = vsel %vm791_vm15, %v787_v38, %v1603_v35  ;;  %v805_v43 = vsel %vm791_vm15, %v788_v40, %v1604_v33  ;;  %v1488_v25 = vpack.c.bf16 %v1084_v2, %v1083_v56  ;;  %v2162_v35 = vld [vmem:[%s2208_s3] ss:$0 sm:$0xff] }
 0x205   :  { %v1619_v45 = vunpack.i.h.bf16 %v1617_v41  ;;  %v1618_v24 = vunpack.i.l.bf16 %v1617_v41  ;;  %v1612_v57 = vpop.permute.xlu0 %1611  ;;  %1428 = vmatprep.mubr.f32.mxu1 %v804_v42 }
 0x206   :  { %v1614_v47 = vunpack.i.h.bf16 %v1612_v57  ;;  %v1613_v46 = vunpack.i.l.bf16 %v1612_v57  ;;  %1429 = vmatmul.mubr.f32.gmra.mrb[12].mxu1 %v805_v43  ;;  %1489 = vmatpush3.bf16.msra.mxu0 %v1488_v25 }
 0x207   :  { %1438 = vmatprep.subr.mxu0 %v1645_v39 }
 0x208   :  { %v789_v50 = vsel %vm774_vm14, %v772_v16, %v1613_v46  ;;  %v790_v52 = vsel %vm774_vm14, %v773_v49, %v1614_v47 }
 0x209   :  { %v806_v53 = vsel %vm791_vm15, %v789_v50, %v1618_v24  ;;  %v807_v54 = vsel %vm791_vm15, %v790_v52, %v1619_v45 }
 0x20a   :  { %1431 = vmatprep.mubr.f32.mxu1 %v806_v53  ;;  %1439 = vmatpush3.msra.mxu0 %v1085_v59 }
 0x20b   :  { %1432 = vmatmul.mubr.f32.gmra.mrb[14].mxu1 %v807_v54 }
 0x2b4   :  { %v1412_v63 = vpop.f32.mrb[0].mxu1 }
 0x2b5   :  { %v972_v0 = vadd.f32 %v1412_v63, %v2137_v60  ;;  %v890_v32 = vpop.f32.mrb[1].mxu1 }
 0x2b6   :  { %v971_v51 = vadd.f32 %v2142_v61, %v890_v32 }
 0x2b7   :  { %v989_v1 = vsel %vm987_vm2, %v972_v0, -inf }
 0x2b8   :  { %v988_v39 = vsel %vm987_vm2, %v971_v51, -inf }
 0x2b9   :  { %v990_v3 = vmax.f32 %v988_v39, %v989_v1  ;;  %v1415_v4 = vpop.f32.mrb[2].mxu1 }
 0x2ba   :  { %v974_v5 = vadd.f32 %v1415_v4, %v2137_v60  ;;  %v900_v8 = vpop.f32.mrb[3].mxu1 }
 0x2bb   :  { %v991_v9 = vrot.slane %v990_v3, 4  ;;  %v973_v48 = vadd.f32 %v2142_v61, %v900_v8 }
 0x2bc   :  { %v998_v10 = vsel %vm987_vm2, %v974_v5, -inf }
 0x2bd   :  { %v992_v11 = vmax.f32 %v990_v3, %v991_v9  ;;  %v997_v44 = vsel %vm987_vm2, %v973_v48, -inf }
 0x2be   :  { %v999_v12 = vmax.f32 %v997_v44, %v998_v10 }
 0x2bf   :  { %v993_v13 = vrot.slane %v992_v11, 2 }
 0x2c0   :  { %v1000_v14 = vrot.slane %v999_v12, 4  ;;  %v1418_v7 = vpop.f32.mrb[4].mxu1 }
 0x2c1   :  { %v994_v17 = vmax.f32 %v992_v11, %v993_v13  ;;  %v976_v62 = vadd.f32 %v1418_v7, %v2137_v60  ;;  %v910_v18 = vpop.f32.mrb[5].mxu1 }
 0x2c2   :  { %v1001_v19 = vmax.f32 %v999_v12, %v1000_v14  ;;  %v975_v20 = vadd.f32 %v2142_v61, %v910_v18 }
 0x2c3   :  { %v1007_v21 = vsel %vm987_vm2, %v976_v62, -inf  ;;  %v995_v22 = vrot.slane %v994_v17, 1 }
 0x2c4   :  { %v1002_v23 = vrot.slane %v1001_v19, 2  ;;  %v1006_v26 = vsel %vm987_vm2, %v975_v20, -inf }
 0x2c5   :  { %v1008_v27 = vmax.f32 %v1006_v26, %v1007_v21  ;;  %v1421_v28 = vpop.f32.mrb[6].mxu1  ;;  %v996_v30 = vmax.f32 %v994_v17, %v995_v22 }
 0x2c6   :  { %v1003_v55 = vmax.f32 %v1001_v19, %v1002_v23  ;;  %v978_v6 = vadd.f32 %v1421_v28, %v2137_v60  ;;  %v920_v29 = vpop.f32.mrb[7].mxu1 }
 0x2c7   :  { %v1009_v15 = vrot.slane %v1008_v27, 4  ;;  %v977_v34 = vadd.f32 %v2142_v61, %v920_v29  ;;  %v1067_v42 = vadd.f32 %v2162_v35, %v996_v30 }
 0x2c8   :  { %v1004_v31 = vrot.slane %v1003_v55, 1  ;;  %v1016_v33 = vsel %vm987_vm2, %v978_v6, -inf }
 0x2c9   :  { %v1010_v36 = vmax.f32 %v1008_v27, %v1009_v15  ;;  %v1015_v37 = vsel %vm987_vm2, %v977_v34, -inf  ;;  %v1075_v54 = vmax.f32 %v1067_v42, 0.0 }
 0x2ca   :  { %v1005_v38 = vmax.f32 %v1003_v55, %v1004_v31  ;;  %v1017_v40 = vmax.f32 %v1015_v37, %v1016_v33 }
 0x2cb   :  { %v1011_v41 = vrot.slane %v1010_v36, 2 }
 0x2cc   :  { %v1068_v43 = vadd.f32 %v2162_v35, %v1005_v38  ;;  %v1018_v45 = vrot.slane %v1017_v40, 4  ;;  %v1424_v24 = vpop.f32.mrb[8].mxu1 }
 0x2cd   :  { %v1012_v57 = vmax.f32 %v1010_v36, %v1011_v41  ;;  %v980_v47 = vadd.f32 %v1424_v24, %v2137_v60  ;;  %v930_v46 = vpop.f32.mrb[9].mxu1 }
 0x2ce   :  { %v1076_v16 = vmax.f32 %v1068_v43, 0.0  ;;  %v1019_v49 = vmax.f32 %v1017_v40, %v1018_v45  ;;  %v979_v50 = vadd.f32 %v2142_v61, %v930_v46 }
 0x2cf   :  { %v1013_v52 = vrot.slane %v1012_v57, 1  ;;  %v1025_v53 = vsel %vm987_vm2, %v980_v47, -inf }
 0x2d0   :  { %v1101_v56 = vrot.slane %v1076_v16, 7  ;;  %v1020_v2 = vrot.slane %v1019_v49, 2  ;;  %v1024_v58 = vsel %vm987_vm2, %v979_v50, -inf }
 0x2d1   :  { %v1014_v25 = vmax.f32 %v1012_v57, %v1013_v52  ;;  %v1026_v59 = vmax.f32 %v1024_v58, %v1025_v53  ;;  %v1427_v63 = vpop.f32.mrb[10].mxu1 }
 0x2d2   :  { %v1103_v0 = vsel %vm1102_vm3, %v1101_v56, %v1075_v54  ;;  %v1021_v32 = vmax.f32 %v1019_v49, %v1020_v2  ;;  %v982_v51 = vadd.f32 %v1427_v63, %v2137_v60  ;;  %v940_v1 = vpop.f32.mrb[11].mxu1 }
 0x2d3   :  { %v1069_v39 = vadd.f32 %v2162_v35, %v1014_v25  ;;  %v1027_v3 = vrot.slane %v1026_v59, 4  ;;  %v981_v4 = vadd.f32 %v2142_v61, %v940_v1 }
 0x2d4   :  { %v1022_v5 = vrot.slane %v1021_v32, 1  ;;  %v1034_v8 = vsel %vm987_vm2, %v982_v51, -inf }
 0x2d5   :  { %v1077_v9 = vmax.f32 %v1069_v39, 0.0  ;;  %v1028_v48 = vmax.f32 %v1026_v59, %v1027_v3  ;;  %v1033_v10 = vsel %vm987_vm2, %v981_v4, -inf }
 0x2d6   :  { %v1023_v11 = vmax.f32 %v1021_v32, %v1022_v5  ;;  %v1035_v44 = vmax.f32 %v1033_v10, %v1034_v8 }
 0x2d7   :  { %v1104_v12 = vrot.slane %v1077_v9, 6  ;;  %v1029_v13 = vrot.slane %v1028_v48, 2  ;;  %v1259_v9 = vld [vmem:[%s2211_s6] ss:$0 sm:$0xff] }
 0x2d8   :  { %v1070_v14 = vadd.f32 %v2162_v35, %v1023_v11  ;;  %v1036_v7 = vrot.slane %v1035_v44, 4 }
 0x2d9   :  { %v1430_v17 = vpop.f32.mrb[12].mxu1  ;;  %v1106_v62 = vsel %vm1105_vm4, %v1104_v12, %v1103_v0  ;;  %v1030_v18 = vmax.f32 %v1028_v48, %v1029_v13 }
 0x2da   :  { %v984_v19 = vadd.f32 %v1430_v17, %v2137_v60  ;;  %v950_v20 = vpop.f32.mrb[13].mxu1  ;;  %v1078_v21 = vmax.f32 %v1070_v14, 0.0  ;;  %v1037_v22 = vmax.f32 %v1035_v44, %v1036_v7 }
 0x2db   :  { %v983_v23 = vadd.f32 %v2142_v61, %v950_v20  ;;  %v1031_v26 = vrot.slane %v1030_v18, 1 }
 0x2dc   :  { %v1043_v27 = vsel %vm987_vm2, %v984_v19, -inf  ;;  %v1107_v28 = vrot.slane %v1078_v21, 5  ;;  %v1038_v55 = vrot.slane %v1037_v22, 2 }
 0x2dd   :  { %v1042_v6 = vsel %vm987_vm2, %v983_v23, -inf  ;;  %v1032_v29 = vmax.f32 %v1030_v18, %v1031_v26 }
 0x2de   :  { %v1044_v15 = vmax.f32 %v1042_v6, %v1043_v27  ;;  %v1433_v34 = vpop.f32.mrb[14].mxu1  ;;  %v1109_v30 = vsel %vm1108_vm5, %v1107_v28, %v1106_v62  ;;  %v1039_v31 = vmax.f32 %v1037_v22, %v1038_v55 }
 0x2df   :  { %v986_v33 = vadd.f32 %v1433_v34, %v2137_v60  ;;  %v960_v36 = vpop.f32.mrb[15].mxu1  ;;  %v1071_v37 = vadd.f32 %v2162_v35, %v1032_v29 }
 0x2e0   :  { %v1045_v38 = vrot.slane %v1044_v15, 4  ;;  %v985_v40 = vadd.f32 %v2142_v61, %v960_v36  ;;  %v1040_v41 = vrot.slane %v1039_v31, 1 }
 0x2e1   :  { %v1052_v42 = vsel %vm987_vm2, %v986_v33, -inf  ;;  %v1079_v43 = vmax.f32 %v1071_v37, 0.0 }
 0x2e2   :  { %v1046_v45 = vmax.f32 %v1044_v15, %v1045_v38  ;;  %v1051_v24 = vsel %vm987_vm2, %v985_v40, -inf  ;;  %v1041_v57 = vmax.f32 %v1039_v31, %v1040_v41 }
 0x2e3   :  { %v1053_v47 = vmax.f32 %v1051_v24, %v1052_v42  ;;  %v1110_v46 = vrot.slane %v1079_v43, 4 }
 0x2e4   :  { %v1047_v16 = vrot.slane %v1046_v45, 2  ;;  %v1072_v60 = vadd.f32 %v2162_v35, %v1041_v57 }
 0x2e5   :  { %v1054_v49 = vrot.slane %v1053_v47, 4  ;;  %v1112_v52 = vsel %vm1111_vm6, %v1110_v46, %v1109_v30 }
 0x2e6   :  { %v1048_v50 = vmax.f32 %v1046_v45, %v1047_v16  ;;  %v1080_v53 = vmax.f32 %v1072_v60, 0.0 }
 0x2e7   :  { %v1055_v54 = vmax.f32 %v1053_v47, %v1054_v49 }
 0x2e8   :  { %v1049_v61 = vrot.slane %v1048_v50, 1  ;;  %v1113_v56 = vrot.slane %v1080_v53, 3 }
 0x2e9   :  { %v1056_v2 = vrot.slane %v1055_v54, 2 }
 0x2ea   :  { %v1050_v58 = vmax.f32 %v1048_v50, %v1049_v61  ;;  %v1115_v59 = vsel %vm1114_vm7, %v1113_v56, %v1112_v52 }
 0x2eb   :  { %v1057_v25 = vmax.f32 %v1055_v54, %v1056_v2 }
 0x2ec   :  { %v1073_v63 = vadd.f32 %v2162_v35, %v1050_v58 }
 0x2ed   :  { %v1058_v0 = vrot.slane %v1057_v25, 1 }
 0x2ee   :  { %v1081_v32 = vmax.f32 %v1073_v63, 0.0 }
 0x2ef   :  { %v1059_v51 = vmax.f32 %v1057_v25, %v1058_v0 }
 0x2f0   :  { %v1116_v1 = vrot.slane %v1081_v32, 2 }
 0x2f1   :  { %v1074_v39 = vadd.f32 %v2162_v35, %v1059_v51 }
 0x2f2   :  { %v1118_v3 = vsel %vm1117_vm8, %v1116_v1, %v1115_v59 }
 0x2f3   :  { %v1082_v4 = vmax.f32 %v1074_v39, 0.0 }
 0x2f5   :  { %v1119_v5 = vrot.slane %v1082_v4, 1 }
 0x2f7   :  { %v1121_v8 = vsel %vm1120_vm9, %v1119_v5, %v1118_v3 }
 0x2f8   :  { %1441 = vmatmul.mubr.msk.f32.vlgmr.msra.gmra.mrb[24].mxu0 %vm987_vm2, %v1121_v8 }
 0x3cb   :  { %v1190_v48 = vpop.f32.mrb[24].mxu0 }
 0x3cc   :  { %v1191_v10 = vadd.f32 %v1259_v9, %v1190_v48  ;;  %v1442_v11 = vpop.f32.mrb[25].mxu0 }
 0x3ce   :  { %1194 = vst [vmem:[#allocation2] sm:$0xff] %v1191_v10 }
 0x3cf   :  { %1631 = shalt.err (!%p1628_p4)
}
 0x3d0   :  { %s1632_s0 = scalar_lea.hbm %s2212_s7, 128 }
 0x3d1   :  { %p1633_p5 = scmp.ne.s32.totalorder %s2212_s7, %s1632_s0  ;;  %p1636_p6 = scmp.lt.u32.totalorder %s1632_s0, %s2212_s7 }
 0x3d3   :  { %p1638_p7 = pnand %p1636_p6, %p1633_p5 }
 0x3d5   :  { %1641 = shalt.err (!%p1638_p7)
}
 0x3d6   :  { %1204 = dma.vmem_to_hbm [thread:$0]  %s1202_s12, 128, %s2212_s7, [#allocation3]  }
 0x3d7   :  { %1642 = dma.done.wait [#allocation3], 128  }
 0x3d8   :  { %1643 = vsyncadd [#allocation3], 4294967168 }
 0x3d9   :  { %1208 = vsyncpa [#allocation3], 1 }

</bundles_post_ra>
